<compile_context>
chip_gen: v5e
topology: v5e:2x2
jax: 0.10.0
libtpu: 0.0.40
codegen_flags: <defaults>
</compile_context>

<pallas_src>
import jax
import jax.numpy as jnp
from jax.experimental import pallas as pl
from jax.experimental.pallas import tpu as pltpu  # noqa: F401  (kept for TPU-specific params if scaled up)

LN_EPS = 1e-5  # torch.nn.LayerNorm default

# Row layout of the packed per-critic vector slab [C, 8, H].
_B1, _G1, _BE1, _B2, _G2, _BE2, _W3, _B3 = range(8)


def _layernorm(h, gamma, beta):
    # Single-pass variance: mean(h) and mean(h*h) are independent reductions that
    # the scheduler can interleave; rsqrt lowers to the EUP.
    mu = jnp.mean(h, axis=-1, keepdims=True)
    ms = jnp.mean(h * h, axis=-1, keepdims=True)
    var = ms - mu * mu
    return (h - mu) * jax.lax.rsqrt(var + LN_EPS) * gamma + beta


def critic_kernel(x_ref, w1_ref, w2_ref, vec_ref, o_ref):
    """One invocation computes the whole critic ensemble.

    x_ref  : [B, D_in]      activations (f32)
    w1_ref : [C, D_in, H]   layer-1 weights (f32 or bf16)
    w2_ref : [C, H, H]      layer-2 weights (f32 or bf16)
    vec_ref: [C, 8, H]      packed b1/g1/be1/b2/g2/be2/w3/b3 (f32)
    o_ref  : [B, C]         Q-values (one lane-dense store)
    """
    x = x_ref[...]
    vec = vec_ref[...]                       # [C, 8, H], f32
    num_critics = w1_ref.shape[0]
    w_dtype = w1_ref.dtype

    qs = []
    for c in range(num_critics):             # static unroll: independent chains interleave
        # ---- Linear 1 + LayerNorm + ReLU ----
        h = jnp.dot(x.astype(w_dtype), w1_ref[c],
                    preferred_element_type=jnp.float32) + vec[c, _B1]
        h = _layernorm(h, vec[c, _G1], vec[c, _BE1])
        h = jnp.maximum(h, 0.0)

        # ---- Linear 2 + LayerNorm + ReLU ----
        h = jnp.dot(h.astype(w_dtype), w2_ref[c],
                    preferred_element_type=jnp.float32) + vec[c, _B2]
        h = _layernorm(h, vec[c, _G2], vec[c, _BE2])
        h = jnp.maximum(h, 0.0)

        # ---- Linear 3 (scalar Q head) on VPU/XLU instead of an N=1 MXU pass ----
        q = jnp.sum(h * vec[c, _W3], axis=-1, keepdims=True) + vec[c, _B3][:1]
        qs.append(q)                          # [B, 1]

    # Single lane-dense store of the whole ensemble output.
    o_ref[...] = jnp.concatenate(qs, axis=-1).astype(o_ref.dtype)   # [B, C]


def critic_forward(x, params, weights_dtype=jnp.float32):
    """x: [B, D_in] float32. Returns a list of C arrays of shape [B, 1] (torch parity)."""
    B, D_in = x.shape
    C, _, H = params["w1"].shape

    # Pack the eight tiny per-critic vectors into one [C, 8, H] slab -> one DMA.
    vec = jnp.stack(
        [
            params["b1"][:, 0, :], params["g1"][:, 0, :], params["be1"][:, 0, :],
            params["b2"][:, 0, :], params["g2"][:, 0, :], params["be2"][:, 0, :],
            params["w3"][:, :, 0],
            jnp.broadcast_to(params["b3"][:, :, 0], (C, H)),
        ],
        axis=1,
    ).astype(jnp.float32)

    w1 = params["w1"].astype(weights_dtype)
    w2 = params["w2"].astype(weights_dtype)

    out = pl.pallas_call(
        critic_kernel,
        out_shape=jax.ShapeDtypeStruct((B, C), jnp.float32),
        # No grid: the whole (small) ensemble runs in one invocation; all operands
        # live fully in VMEM, eliminating per-critic pipeline overhead and the
        # seven tiny per-step DMAs.
        # TODO(synk): for production-scale hidden_dim / num_critics, re-introduce a
        # K-tiled "arbitrary" grid axis on W2 (and bf16 weights) to respect v7x's
        # 64 MiB VMEM with double buffering, plus a size-2 "parallel" leading axis
        # so both v7x TensorCores are engaged.
    )(x, w1, w2, vec)

    # Mirror the torch module's list-of-tensors output.
    return [out[:, c:c + 1] for c in range(C)]


def init_params(key, obs_dim, act_dim, num_critics, hidden_dim):
    d_in = obs_dim + act_dim
    keys = jax.random.split(key, 6)

    def dense(k, fan_in, shape):
        return jax.random.normal(k, shape, jnp.float32) / jnp.sqrt(fan_in)

    C, H = num_critics, hidden_dim
    return {
        "w1": dense(keys[0], d_in, (C, d_in, H)),
        "b1": jnp.zeros((C, 1, H), jnp.float32),
        "g1": jnp.ones((C, 1, H), jnp.float32),
        "be1": jnp.zeros((C, 1, H), jnp.float32),
        "w2": dense(keys[1], H, (C, H, H)),
        "b2": jnp.zeros((C, 1, H), jnp.float32),
        "g2": jnp.ones((C, 1, H), jnp.float32),
        "be2": jnp.zeros((C, 1, H), jnp.float32),
        "w3": dense(keys[2], H, (C, H, 1)),
        "b3": jnp.zeros((C, 1, 1), jnp.float32),
    }


def _layernorm_ref(h, gamma, beta):
    # Torch-style two-pass LayerNorm (independent of the kernel's single-pass form).
    mu = jnp.mean(h, axis=-1, keepdims=True)
    var = jnp.mean((h - mu) * (h - mu), axis=-1, keepdims=True)
    return (h - mu) * jax.lax.rsqrt(var + LN_EPS) * gamma + beta


def critic_reference(x, params):
    """Pure-JAX reference for correctness checking."""
    outs = []
    C = params["w1"].shape[0]
    for c in range(C):
        h = x @ params["w1"][c] + params["b1"][c]
        h = _layernorm_ref(h, params["g1"][c], params["be1"][c])
        h = jnp.maximum(h, 0.0)
        h = h @ params["w2"][c] + params["b2"][c]
        h = _layernorm_ref(h, params["g2"][c], params["be2"][c])
        h = jnp.maximum(h, 0.0)
        outs.append(h @ params["w3"][c] + params["b3"][c])
    return outs


if __name__ == "__main__":
    key = jax.random.PRNGKey(0)
    k_obs, k_act, k_par = jax.random.split(key, 3)

    # Small shapes consistent with the module's forward.
    batch, obs_dim, act_dim = 8, 24, 8
    num_critics, hidden_dim = 2, 32

    obs = jax.random.normal(k_obs, (batch, obs_dim), jnp.float32)
    action = jax.random.normal(k_act, (batch, act_dim), jnp.float32)
    params = init_params(k_par, obs_dim, act_dim, num_critics, hidden_dim)

    # Concatenation glue (torch.cat([obs, action], dim=-1)) stays in plain JAX.
    h_action = jnp.concatenate([obs, action], axis=-1)

    refs = critic_reference(h_action, params)

    # f32 weights: tight parity with the reference.
    outs = critic_forward(h_action, params)
    outs = [jax.block_until_ready(o) for o in outs]
    for o, r in zip(outs, refs):
        assert o.shape == (batch, 1)
        assert jnp.allclose(o, r, atol=1e-4, rtol=1e-4)

    # bf16 MXU weights (v6e/v7x fast path); LayerNorm / bias math stays f32.
    outs_bf16 = critic_forward(h_action, params, weights_dtype=jnp.bfloat16)
    outs_bf16 = [jax.block_until_ready(o) for o in outs_bf16]
    for o, r in zip(outs_bf16, refs):
        assert o.shape == (batch, 1)
        assert jnp.allclose(o, r, atol=1e-1, rtol=1e-1)

    print("KERNEL_OK")
</pallas_src>

<mosaic_0001>
module attributes {stable_mosaic.version = 11 : i64} {
  func.func @critic_kernel(%arg0: memref<8x32xf32, #tpu.memory_space<vmem>>, %arg1: memref<2x32x32xf32, #tpu.memory_space<vmem>>, %arg2: memref<2x32x32xf32, #tpu.memory_space<vmem>>, %arg3: memref<2x8x32xf32, #tpu.memory_space<vmem>>, %arg4: memref<8x2xf32, #tpu.memory_space<vmem>>) attributes {dimension_semantics = [], scalar_prefetch = 0 : i64, scratch_operands = 0 : i64, tpu.core_type = #tpu.core_type<tc>} {
    %c0 = arith.constant 0 : index
    %c0_0 = arith.constant 0 : index
    %0 = vector.load %arg0[%c0, %c0_0] : memref<8x32xf32, #tpu.memory_space<vmem>>, vector<8x32xf32>
    %c0_1 = arith.constant 0 : index
    %c0_2 = arith.constant 0 : index
    %c0_3 = arith.constant 0 : index
    %1 = vector.load %arg3[%c0_1, %c0_2, %c0_3] : memref<2x8x32xf32, #tpu.memory_space<vmem>>, vector<2x8x32xf32>
    %c0_4 = arith.constant 0 : index
    %c0_5 = arith.constant 0 : index
    %c0_6 = arith.constant 0 : index
    %2 = vector.load %arg1[%c0_4, %c0_5, %c0_6] : memref<2x32x32xf32, #tpu.memory_space<vmem>>, vector<1x32x32xf32>
    %3 = vector.shape_cast %2 : vector<1x32x32xf32> to vector<32x32xf32>
    %cst = arith.constant dense<0.000000e+00> : vector<8x32xf32>
    %4 = tpu.matmul %0, %3, %cst {dimension_numbers = #tpu.dot_dimension_numbers<[1], [0], [0], [1], [0, 0, 1, 1], [], []>} : vector<8x32xf32>, vector<32x32xf32>, vector<8x32xf32> -> vector<8x32xf32>
    %5 = vector.extract_strided_slice %1 {offsets = [0, 0, 0], sizes = [1, 1, 32], strides = [1, 1, 1]} : vector<2x8x32xf32> to vector<1x1x32xf32>
    %6 = vector.shape_cast %5 : vector<1x1x32xf32> to vector<32xf32>
    %7 = vector.shape_cast %6 : vector<32xf32> to vector<1x32xf32>
    %8 = vector.broadcast %7 : vector<1x32xf32> to vector<8x32xf32>
    %9 = arith.addf %4, %8 : vector<8x32xf32>
    %10 = vector.extract_strided_slice %1 {offsets = [0, 1, 0], sizes = [1, 1, 32], strides = [1, 1, 1]} : vector<2x8x32xf32> to vector<1x1x32xf32>
    %11 = vector.shape_cast %10 : vector<1x1x32xf32> to vector<32xf32>
    %12 = vector.extract_strided_slice %1 {offsets = [0, 2, 0], sizes = [1, 1, 32], strides = [1, 1, 1]} : vector<2x8x32xf32> to vector<1x1x32xf32>
    %13 = vector.shape_cast %12 : vector<1x1x32xf32> to vector<32xf32>
    %cst_7 = arith.constant dense<0.000000e+00> : vector<8xf32>
    %14 = vector.multi_reduction <add>, %9, %cst_7 [1] : vector<8x32xf32> to vector<8xf32>
    %15 = vector.shape_cast %14 : vector<8xf32> to vector<8x1xf32>
    %cst_8 = arith.constant 3.200000e+01 : f32
    %16 = vector.broadcast %cst_8 : f32 to vector<8x1xf32>
    %17 = arith.divf %15, %16 : vector<8x1xf32>
    %18 = arith.mulf %9, %9 : vector<8x32xf32>
    %cst_9 = arith.constant dense<0.000000e+00> : vector<8xf32>
    %19 = vector.multi_reduction <add>, %18, %cst_9 [1] : vector<8x32xf32> to vector<8xf32>
    %20 = vector.shape_cast %19 : vector<8xf32> to vector<8x1xf32>
    %cst_10 = arith.constant 3.200000e+01 : f32
    %21 = vector.broadcast %cst_10 : f32 to vector<8x1xf32>
    %22 = arith.divf %20, %21 : vector<8x1xf32>
    %23 = arith.mulf %17, %17 : vector<8x1xf32>
    %24 = arith.subf %22, %23 : vector<8x1xf32>
    %25 = vector.broadcast %17 : vector<8x1xf32> to vector<8x32xf32>
    %26 = arith.subf %9, %25 : vector<8x32xf32>
    %cst_11 = arith.constant 9.99999974E-6 : f32
    %27 = vector.broadcast %cst_11 : f32 to vector<8x1xf32>
    %28 = arith.addf %24, %27 : vector<8x1xf32>
    %29 = math.rsqrt %28 : vector<8x1xf32>
    %30 = vector.broadcast %29 : vector<8x1xf32> to vector<8x32xf32>
    %31 = arith.mulf %26, %30 : vector<8x32xf32>
    %32 = vector.shape_cast %11 : vector<32xf32> to vector<1x32xf32>
    %33 = vector.broadcast %32 : vector<1x32xf32> to vector<8x32xf32>
    %34 = arith.mulf %31, %33 : vector<8x32xf32>
    %35 = vector.shape_cast %13 : vector<32xf32> to vector<1x32xf32>
    %36 = vector.broadcast %35 : vector<1x32xf32> to vector<8x32xf32>
    %37 = arith.addf %34, %36 : vector<8x32xf32>
    %cst_12 = arith.constant 0.000000e+00 : f32
    %38 = vector.broadcast %cst_12 : f32 to vector<8x32xf32>
    %39 = arith.maximumf %37, %38 : vector<8x32xf32>
    %c0_13 = arith.constant 0 : index
    %c0_14 = arith.constant 0 : index
    %c0_15 = arith.constant 0 : index
    %40 = vector.load %arg2[%c0_13, %c0_14, %c0_15] : memref<2x32x32xf32, #tpu.memory_space<vmem>>, vector<1x32x32xf32>
    %41 = vector.shape_cast %40 : vector<1x32x32xf32> to vector<32x32xf32>
    %cst_16 = arith.constant dense<0.000000e+00> : vector<8x32xf32>
    %42 = tpu.matmul %39, %41, %cst_16 {dimension_numbers = #tpu.dot_dimension_numbers<[1], [0], [0], [1], [0, 0, 1, 1], [], []>} : vector<8x32xf32>, vector<32x32xf32>, vector<8x32xf32> -> vector<8x32xf32>
    %43 = vector.extract_strided_slice %1 {offsets = [0, 3, 0], sizes = [1, 1, 32], strides = [1, 1, 1]} : vector<2x8x32xf32> to vector<1x1x32xf32>
    %44 = vector.shape_cast %43 : vector<1x1x32xf32> to vector<32xf32>
    %45 = vector.shape_cast %44 : vector<32xf32> to vector<1x32xf32>
    %46 = vector.broadcast %45 : vector<1x32xf32> to vector<8x32xf32>
    %47 = arith.addf %42, %46 : vector<8x32xf32>
    %48 = vector.extract_strided_slice %1 {offsets = [0, 4, 0], sizes = [1, 1, 32], strides = [1, 1, 1]} : vector<2x8x32xf32> to vector<1x1x32xf32>
    %49 = vector.shape_cast %48 : vector<1x1x32xf32> to vector<32xf32>
    %50 = vector.extract_strided_slice %1 {offsets = [0, 5, 0], sizes = [1, 1, 32], strides = [1, 1, 1]} : vector<2x8x32xf32> to vector<1x1x32xf32>
    %51 = vector.shape_cast %50 : vector<1x1x32xf32> to vector<32xf32>
    %cst_17 = arith.constant dense<0.000000e+00> : vector<8xf32>
    %52 = vector.multi_reduction <add>, %47, %cst_17 [1] : vector<8x32xf32> to vector<8xf32>
    %53 = vector.shape_cast %52 : vector<8xf32> to vector<8x1xf32>
    %cst_18 = arith.constant 3.200000e+01 : f32
    %54 = vector.broadcast %cst_18 : f32 to vector<8x1xf32>
    %55 = arith.divf %53, %54 : vector<8x1xf32>
    %56 = arith.mulf %47, %47 : vector<8x32xf32>
    %cst_19 = arith.constant dense<0.000000e+00> : vector<8xf32>
    %57 = vector.multi_reduction <add>, %56, %cst_19 [1] : vector<8x32xf32> to vector<8xf32>
    %58 = vector.shape_cast %57 : vector<8xf32> to vector<8x1xf32>
    %cst_20 = arith.constant 3.200000e+01 : f32
    %59 = vector.broadcast %cst_20 : f32 to vector<8x1xf32>
    %60 = arith.divf %58, %59 : vector<8x1xf32>
    %61 = arith.mulf %55, %55 : vector<8x1xf32>
    %62 = arith.subf %60, %61 : vector<8x1xf32>
    %63 = vector.broadcast %55 : vector<8x1xf32> to vector<8x32xf32>
    %64 = arith.subf %47, %63 : vector<8x32xf32>
    %cst_21 = arith.constant 9.99999974E-6 : f32
    %65 = vector.broadcast %cst_21 : f32 to vector<8x1xf32>
    %66 = arith.addf %62, %65 : vector<8x1xf32>
    %67 = math.rsqrt %66 : vector<8x1xf32>
    %68 = vector.broadcast %67 : vector<8x1xf32> to vector<8x32xf32>
    %69 = arith.mulf %64, %68 : vector<8x32xf32>
    %70 = vector.shape_cast %49 : vector<32xf32> to vector<1x32xf32>
    %71 = vector.broadcast %70 : vector<1x32xf32> to vector<8x32xf32>
    %72 = arith.mulf %69, %71 : vector<8x32xf32>
    %73 = vector.shape_cast %51 : vector<32xf32> to vector<1x32xf32>
    %74 = vector.broadcast %73 : vector<1x32xf32> to vector<8x32xf32>
    %75 = arith.addf %72, %74 : vector<8x32xf32>
    %cst_22 = arith.constant 0.000000e+00 : f32
    %76 = vector.broadcast %cst_22 : f32 to vector<8x32xf32>
    %77 = arith.maximumf %75, %76 : vector<8x32xf32>
    %78 = vector.extract_strided_slice %1 {offsets = [0, 6, 0], sizes = [1, 1, 32], strides = [1, 1, 1]} : vector<2x8x32xf32> to vector<1x1x32xf32>
    %79 = vector.shape_cast %78 : vector<1x1x32xf32> to vector<32xf32>
    %80 = vector.shape_cast %79 : vector<32xf32> to vector<1x32xf32>
    %81 = vector.broadcast %80 : vector<1x32xf32> to vector<8x32xf32>
    %82 = arith.mulf %77, %81 : vector<8x32xf32>
    %cst_23 = arith.constant dense<0.000000e+00> : vector<8xf32>
    %83 = vector.multi_reduction <add>, %82, %cst_23 [1] : vector<8x32xf32> to vector<8xf32>
    %84 = vector.shape_cast %83 : vector<8xf32> to vector<8x1xf32>
    %85 = vector.extract_strided_slice %1 {offsets = [0, 7, 0], sizes = [1, 1, 32], strides = [1, 1, 1]} : vector<2x8x32xf32> to vector<1x1x32xf32>
    %86 = vector.shape_cast %85 : vector<1x1x32xf32> to vector<32xf32>
    %87 = vector.extract_strided_slice %86 {offsets = [0], sizes = [1], strides = [1]} : vector<32xf32> to vector<1xf32>
    %88 = vector.shape_cast %87 : vector<1xf32> to vector<1x1xf32>
    %89 = vector.broadcast %88 : vector<1x1xf32> to vector<8x1xf32>
    %90 = arith.addf %84, %89 : vector<8x1xf32>
    %c1 = arith.constant 1 : index
    %c0_24 = arith.constant 0 : index
    %c0_25 = arith.constant 0 : index
    %91 = vector.load %arg1[%c1, %c0_24, %c0_25] : memref<2x32x32xf32, #tpu.memory_space<vmem>>, vector<1x32x32xf32>
    %92 = vector.shape_cast %91 : vector<1x32x32xf32> to vector<32x32xf32>
    %cst_26 = arith.constant dense<0.000000e+00> : vector<8x32xf32>
    %93 = tpu.matmul %0, %92, %cst_26 {dimension_numbers = #tpu.dot_dimension_numbers<[1], [0], [0], [1], [0, 0, 1, 1], [], []>} : vector<8x32xf32>, vector<32x32xf32>, vector<8x32xf32> -> vector<8x32xf32>
    %94 = vector.extract_strided_slice %1 {offsets = [1, 0, 0], sizes = [1, 1, 32], strides = [1, 1, 1]} : vector<2x8x32xf32> to vector<1x1x32xf32>
    %95 = vector.shape_cast %94 : vector<1x1x32xf32> to vector<32xf32>
    %96 = vector.shape_cast %95 : vector<32xf32> to vector<1x32xf32>
    %97 = vector.broadcast %96 : vector<1x32xf32> to vector<8x32xf32>
    %98 = arith.addf %93, %97 : vector<8x32xf32>
    %99 = vector.extract_strided_slice %1 {offsets = [1, 1, 0], sizes = [1, 1, 32], strides = [1, 1, 1]} : vector<2x8x32xf32> to vector<1x1x32xf32>
    %100 = vector.shape_cast %99 : vector<1x1x32xf32> to vector<32xf32>
    %101 = vector.extract_strided_slice %1 {offsets = [1, 2, 0], sizes = [1, 1, 32], strides = [1, 1, 1]} : vector<2x8x32xf32> to vector<1x1x32xf32>
    %102 = vector.shape_cast %101 : vector<1x1x32xf32> to vector<32xf32>
    %cst_27 = arith.constant dense<0.000000e+00> : vector<8xf32>
    %103 = vector.multi_reduction <add>, %98, %cst_27 [1] : vector<8x32xf32> to vector<8xf32>
    %104 = vector.shape_cast %103 : vector<8xf32> to vector<8x1xf32>
    %cst_28 = arith.constant 3.200000e+01 : f32
    %105 = vector.broadcast %cst_28 : f32 to vector<8x1xf32>
    %106 = arith.divf %104, %105 : vector<8x1xf32>
    %107 = arith.mulf %98, %98 : vector<8x32xf32>
    %cst_29 = arith.constant dense<0.000000e+00> : vector<8xf32>
    %108 = vector.multi_reduction <add>, %107, %cst_29 [1] : vector<8x32xf32> to vector<8xf32>
    %109 = vector.shape_cast %108 : vector<8xf32> to vector<8x1xf32>
    %cst_30 = arith.constant 3.200000e+01 : f32
    %110 = vector.broadcast %cst_30 : f32 to vector<8x1xf32>
    %111 = arith.divf %109, %110 : vector<8x1xf32>
    %112 = arith.mulf %106, %106 : vector<8x1xf32>
    %113 = arith.subf %111, %112 : vector<8x1xf32>
    %114 = vector.broadcast %106 : vector<8x1xf32> to vector<8x32xf32>
    %115 = arith.subf %98, %114 : vector<8x32xf32>
    %cst_31 = arith.constant 9.99999974E-6 : f32
    %116 = vector.broadcast %cst_31 : f32 to vector<8x1xf32>
    %117 = arith.addf %113, %116 : vector<8x1xf32>
    %118 = math.rsqrt %117 : vector<8x1xf32>
    %119 = vector.broadcast %118 : vector<8x1xf32> to vector<8x32xf32>
    %120 = arith.mulf %115, %119 : vector<8x32xf32>
    %121 = vector.shape_cast %100 : vector<32xf32> to vector<1x32xf32>
    %122 = vector.broadcast %121 : vector<1x32xf32> to vector<8x32xf32>
    %123 = arith.mulf %120, %122 : vector<8x32xf32>
    %124 = vector.shape_cast %102 : vector<32xf32> to vector<1x32xf32>
    %125 = vector.broadcast %124 : vector<1x32xf32> to vector<8x32xf32>
    %126 = arith.addf %123, %125 : vector<8x32xf32>
    %cst_32 = arith.constant 0.000000e+00 : f32
    %127 = vector.broadcast %cst_32 : f32 to vector<8x32xf32>
    %128 = arith.maximumf %126, %127 : vector<8x32xf32>
    %c1_33 = arith.constant 1 : index
    %c0_34 = arith.constant 0 : index
    %c0_35 = arith.constant 0 : index
    %129 = vector.load %arg2[%c1_33, %c0_34, %c0_35] : memref<2x32x32xf32, #tpu.memory_space<vmem>>, vector<1x32x32xf32>
    %130 = vector.shape_cast %129 : vector<1x32x32xf32> to vector<32x32xf32>
    %cst_36 = arith.constant dense<0.000000e+00> : vector<8x32xf32>
    %131 = tpu.matmul %128, %130, %cst_36 {dimension_numbers = #tpu.dot_dimension_numbers<[1], [0], [0], [1], [0, 0, 1, 1], [], []>} : vector<8x32xf32>, vector<32x32xf32>, vector<8x32xf32> -> vector<8x32xf32>
    %132 = vector.extract_strided_slice %1 {offsets = [1, 3, 0], sizes = [1, 1, 32], strides = [1, 1, 1]} : vector<2x8x32xf32> to vector<1x1x32xf32>
    %133 = vector.shape_cast %132 : vector<1x1x32xf32> to vector<32xf32>
    %134 = vector.shape_cast %133 : vector<32xf32> to vector<1x32xf32>
    %135 = vector.broadcast %134 : vector<1x32xf32> to vector<8x32xf32>
    %136 = arith.addf %131, %135 : vector<8x32xf32>
    %137 = vector.extract_strided_slice %1 {offsets = [1, 4, 0], sizes = [1, 1, 32], strides = [1, 1, 1]} : vector<2x8x32xf32> to vector<1x1x32xf32>
    %138 = vector.shape_cast %137 : vector<1x1x32xf32> to vector<32xf32>
    %139 = vector.extract_strided_slice %1 {offsets = [1, 5, 0], sizes = [1, 1, 32], strides = [1, 1, 1]} : vector<2x8x32xf32> to vector<1x1x32xf32>
    %140 = vector.shape_cast %139 : vector<1x1x32xf32> to vector<32xf32>
    %cst_37 = arith.constant dense<0.000000e+00> : vector<8xf32>
    %141 = vector.multi_reduction <add>, %136, %cst_37 [1] : vector<8x32xf32> to vector<8xf32>
    %142 = vector.shape_cast %141 : vector<8xf32> to vector<8x1xf32>
    %cst_38 = arith.constant 3.200000e+01 : f32
    %143 = vector.broadcast %cst_38 : f32 to vector<8x1xf32>
    %144 = arith.divf %142, %143 : vector<8x1xf32>
    %145 = arith.mulf %136, %136 : vector<8x32xf32>
    %cst_39 = arith.constant dense<0.000000e+00> : vector<8xf32>
    %146 = vector.multi_reduction <add>, %145, %cst_39 [1] : vector<8x32xf32> to vector<8xf32>
    %147 = vector.shape_cast %146 : vector<8xf32> to vector<8x1xf32>
    %cst_40 = arith.constant 3.200000e+01 : f32
    %148 = vector.broadcast %cst_40 : f32 to vector<8x1xf32>
    %149 = arith.divf %147, %148 : vector<8x1xf32>
    %150 = arith.mulf %144, %144 : vector<8x1xf32>
    %151 = arith.subf %149, %150 : vector<8x1xf32>
    %152 = vector.broadcast %144 : vector<8x1xf32> to vector<8x32xf32>
    %153 = arith.subf %136, %152 : vector<8x32xf32>
    %cst_41 = arith.constant 9.99999974E-6 : f32
    %154 = vector.broadcast %cst_41 : f32 to vector<8x1xf32>
    %155 = arith.addf %151, %154 : vector<8x1xf32>
    %156 = math.rsqrt %155 : vector<8x1xf32>
    %157 = vector.broadcast %156 : vector<8x1xf32> to vector<8x32xf32>
    %158 = arith.mulf %153, %157 : vector<8x32xf32>
    %159 = vector.shape_cast %138 : vector<32xf32> to vector<1x32xf32>
    %160 = vector.broadcast %159 : vector<1x32xf32> to vector<8x32xf32>
    %161 = arith.mulf %158, %160 : vector<8x32xf32>
    %162 = vector.shape_cast %140 : vector<32xf32> to vector<1x32xf32>
    %163 = vector.broadcast %162 : vector<1x32xf32> to vector<8x32xf32>
    %164 = arith.addf %161, %163 : vector<8x32xf32>
    %cst_42 = arith.constant 0.000000e+00 : f32
    %165 = vector.broadcast %cst_42 : f32 to vector<8x32xf32>
    %166 = arith.maximumf %164, %165 : vector<8x32xf32>
    %167 = vector.extract_strided_slice %1 {offsets = [1, 6, 0], sizes = [1, 1, 32], strides = [1, 1, 1]} : vector<2x8x32xf32> to vector<1x1x32xf32>
    %168 = vector.shape_cast %167 : vector<1x1x32xf32> to vector<32xf32>
    %169 = vector.shape_cast %168 : vector<32xf32> to vector<1x32xf32>
    %170 = vector.broadcast %169 : vector<1x32xf32> to vector<8x32xf32>
    %171 = arith.mulf %166, %170 : vector<8x32xf32>
    %cst_43 = arith.constant dense<0.000000e+00> : vector<8xf32>
    %172 = vector.multi_reduction <add>, %171, %cst_43 [1] : vector<8x32xf32> to vector<8xf32>
    %173 = vector.shape_cast %172 : vector<8xf32> to vector<8x1xf32>
    %174 = vector.extract_strided_slice %1 {offsets = [1, 7, 0], sizes = [1, 1, 32], strides = [1, 1, 1]} : vector<2x8x32xf32> to vector<1x1x32xf32>
    %175 = vector.shape_cast %174 : vector<1x1x32xf32> to vector<32xf32>
    %176 = vector.extract_strided_slice %175 {offsets = [0], sizes = [1], strides = [1]} : vector<32xf32> to vector<1xf32>
    %177 = vector.shape_cast %176 : vector<1xf32> to vector<1x1xf32>
    %178 = vector.broadcast %177 : vector<1x1xf32> to vector<8x1xf32>
    %179 = arith.addf %173, %178 : vector<8x1xf32>
    %180 = tpu.concatenate %90, %179 in 1 : vector<8x1xf32>, vector<8x1xf32> -> vector<8x2xf32>
    %c0_44 = arith.constant 0 : index
    %c0_45 = arith.constant 0 : index
    %181 = vector.load %arg4[%c0_44, %c0_45] : memref<8x2xf32, #tpu.memory_space<vmem>>, vector<8x2xf32>
    tpu.vector_store %arg4[%c0_44, %c0_45], %180 {strides = array<i32>} : memref<8x2xf32, #tpu.memory_space<vmem>>, vector<8x2xf32>,
    return
  }
}

</mosaic_0001>

<bundles_post_ra>
// kernel: tpu_custom_call.1
= control target key start
LH: loop header
LB: loop body
LE: loop exit
PB: predicated region body
PF: predicated region fallthrough
CT: control target
= control target key end

     0   :  { %9 = vsyncpa [#allocation3], 0  ;;  %s573_s0 = inlined_call_operand.hbm [shape: f32[8,32], index: 0, kind: input, shape index: {}]   ;;  %s574_s1 = inlined_call_operand.hbm [shape: f32[2,32,32], index: 1, kind: input, shape index: {}]   ;;  %s575_s2 = inlined_call_operand.hbm [shape: f32[2,32,32], index: 2, kind: input, shape index: {}]   ;;  %s576_s3 = inlined_call_operand.hbm [shape: f32[2,8,32], index: 3, kind: input, shape index: {}]   ;;  %s577_s4 = inlined_call_operand.vmem [shape: f32[8,2], index: 4, kind: output, shape index: {}]  }
   0x1   :  { %10 = vsyncpa [#allocation5], 0  ;;  %s27_s17 = sshll.u32 %s574_s1, 4  ;;  %s28_s17 = int_to_ptr.hbm [resolvable:$true] %s27_s17 }
   0x2   :  { %11 = vsyncpa [#allocation8], 0  ;;  %s469_s18 = smov [#allocation4]   ;;  %s17_s22 = sshll.u32 %s573_s0, 4  ;;  %s18_s22 = int_to_ptr.hbm [resolvable:$true] %s17_s22 }
   0x3   :  { %s29_s19 = sshll.u32 %s469_s18, 4  ;;  %s470_s23 = smov 128   ;;  %s30_s19 = int_to_ptr.vmem [resolvable:$true] %s29_s19 }
   0x4   :  { %s471_s24 = smov 8   ;;  %s472_s25 = smov [#allocation2]  }
   0x5   :  { %35 = dma.hbm_to_vmem [thread:$0]  %s28_s17, 1024, %s30_s19, [#allocation5], %s470_s23, %s470_s23, %s471_s24  }
   0x6   :  { %s19_s26 = sshll.u32 %s472_s25, 4  ;;  %s40_s29 = sshll.u32 %s575_s2, 4  ;;  %s20_s26 = int_to_ptr.vmem [resolvable:$true] %s19_s26  ;;  %s41_s29 = int_to_ptr.hbm [resolvable:$true] %s40_s29 }
   0x7   :  { %22 = dma.hbm_to_vmem [thread:$0]  %s18_s22, 128, %s20_s26, [#allocation3]  }
   0x8   :  { %s53_s5 = sshll.u32 %s576_s3, 4  ;;  %s473_s6 = smov [#allocation6]   ;;  %s54_s5 = int_to_ptr.hbm [resolvable:$true] %s53_s5 }
   0x9   :  { %s42_s7 = sshll.u32 %s473_s6, 4  ;;  %s474_s0 = smov [#allocation7]   ;;  %s43_s7 = int_to_ptr.vmem [resolvable:$true] %s42_s7 }
   0xa   :  { %48 = dma.hbm_to_vmem [thread:$0]  %s41_s29, 1024, %s43_s7, [#allocation5], %s470_s23, %s470_s23, %s471_s24  }
   0xb   :  { %s55_s8 = sshll.u32 %s474_s0, 4  ;;  %s56_s8 = int_to_ptr.vmem [resolvable:$true] %s55_s8 }
   0xc   :  { %61 = dma.hbm_to_vmem [thread:$0]  %s54_s5, 256, %s56_s8, [#allocation8], %s470_s23, %s470_s23, %s471_s24  }
   0xd   :  { %463 = dma.done.wait [#allocation3], 128  }
   0xe   :  { %464 = vsyncadd [#allocation3], 4294967168 }
   0xf   :  { %465 = dma.done.wait [#allocation5], 2048  }
  0x10   :  { %466 = vsyncadd [#allocation5], 4294965248 }
  0x11   :  { %467 = dma.done.wait [#allocation8], 256  }
  0x12   :  { %468 = vsyncadd [#allocation8], 4294967040  ;;  %v84_v0 = vld [vmem:[#allocation4 + $0x18] sm:$0xff]  ;;  %v83_v2 = vld [vmem:[#allocation4 + $0x10] sm:$0xff]  ;;  %vm86_vm0 = vcmask 261120   ;;  %v475_v23 = vmov 32.0  }
  0x13   :  { %v214_v1 = vld [vmem:[#allocation4 + $0x38] sm:$0xff]  ;;  %102 = vmatpush.msra.mxu0 %v84_v0  ;;  %v213_v3 = vld [vmem:[#allocation4 + $0x30] sm:$0xff]  ;;  %v82_v4 = vld [vmem:[#allocation4 + $0x8] sm:$0xff]  ;;  %357 = vrcp.f32 %v475_v23  ;;  %s476_s2 = smov 1   ;;  %vm334_vm14 = vcmask 7168   ;;  %vm336_vm15 = vcmask 15360  }
  0x14   :  { %228 = vmatpush.msra.mxu2 %v214_v1  ;;  %v212_v5 = vld [vmem:[#allocation4 + $0x28] sm:$0xff]  ;;  %v81_v6 = vld [vmem:[#allocation4] sm:$0xff]  ;;  %v78_v8 = vld [vmem:[#allocation2] sm:$0xff] }
  0x15   :  { %103 = vmatpush.msra.mxu0 %v83_v2  ;;  %v211_v7 = vld [vmem:[#allocation4 + $0x20] sm:$0xff]  ;;  %v519_v12 = vld [vmem:[#allocation7 + $0x8] sm:$0xff]  ;;  %v149_v31 = vld [vmem:[#allocation6 + $0x18] sm:$0xff] }
  0x16   :  { %229 = vmatpush.msra.mxu2 %v213_v3  ;;  %v516_v9 = vld [vmem:[#allocation7] sm:$0xff]  ;;  %v215_v15 = vperm.slane %v519_v12, 0  ;;  %166 = vmatpush.msra.mxu1 %v149_v31  ;;  %v148_v33 = vld [vmem:[#allocation6 + $0x10] sm:$0xff]  ;;  %v147_v34 = vld [vmem:[#allocation6 + $0x8] sm:$0xff] }
  0x17   :  { %104 = vmatpush.msra.mxu0 %v82_v4  ;;  %v85_v10 = vperm.slane %v516_v9, 0  ;;  %v269_v35 = vld [vmem:[#allocation6 + $0x38] sm:$0xff]  ;;  %v146_v36 = vld [vmem:[#allocation6] sm:$0xff]  ;;  %v268_v41 = vld [vmem:[#allocation6 + $0x30] sm:$0xff]  ;;  %v141_v62 = vperm.slane %v516_v9, 1  ;;  %v143_v2 = vperm.slane %v516_v9, 2 }
  0x18   :  { %230 = vmatpush.msra.mxu2 %v212_v5  ;;  %167 = vmatpush.msra.mxu1 %v148_v33  ;;  %v267_v42 = vld [vmem:[#allocation6 + $0x28] sm:$0xff]  ;;  %v266_v45 = vld [vmem:[#allocation6 + $0x20] sm:$0xff] }
  0x19   :  { %105 = vmatpush.msra.mxu0 %v81_v6  ;;  %v358_v24 = vpop.eup %357  ;;  %286 = vmatpush.msra.mxu3 %v269_v35 }
  0x1a   :  { %231 = vmatpush.msra.mxu2 %v211_v7  ;;  %345 = vmatmul.msk.f32.vlgmr.msra.gmra.mxu0 %vm86_vm0, %v78_v8  ;;  %v114_v25 = vmul.f32 32.0, %v358_v24  ;;  %vm118_vm1 = vweird.f32 %v358_v24 }
  0x1b   :  { %347 = vmatmul.msk.f32.vlgmr.msra.gmra.mxu2 %vm86_vm0, %v78_v8  ;;  %168 = vmatpush.msra.mxu1 %v147_v34  ;;  %v260_v8 = vperm.slane %v519_v12, 1 }
  0x1c   :  { %v115_v26 = vsub.f32 1.0, %v114_v25  ;;  %287 = vmatpush.msra.mxu3 %v268_v41 }
  0x1d   :  { %169 = vmatpush.msra.mxu1 %v146_v36 }
  0x1e   :  { %v116_v27 = vmul.f32 %v358_v24, %v115_v26  ;;  %288 = vmatpush.msra.mxu3 %v267_v42 }
  0x20   :  { %v117_v28 = vadd.f32 %v358_v24, %v116_v27  ;;  %289 = vmatpush.msra.mxu3 %v266_v45 }
  0x22   :  { %v536_v29 = vsel %vm118_vm1, %v358_v24, %v117_v28  ;;  %v270_v24 = vperm.slane %v519_v12, 3 }
  0x97   :  { %v107_v11 = vpop.f32.mrf.mxu0 }
  0x98   :  { %v521_v13 = vadd.f32 %v107_v11, %v85_v10 }
  0x9a   :  { %v110_v14 = vsel %vm86_vm0, %v521_v13, 0.0  ;;  %v121_v16 = vmul.f32 %v521_v13, %v521_v13 }
  0x9b   :  { %111 = vadd.xlane.f32.xlu1 %v110_v14  ;;  %v262_v14 = vperm.slane %v519_v12, 2 }
  0x9c   :  { %v122_v20 = vsel %vm86_vm0, %v121_v16, 0.0 }
  0x9e   :  { %v233_v17 = vpop.f32.mrf.mxu2 }
  0x9f   :  { %v528_v18 = vadd.f32 %v233_v17, %v215_v15 }
  0xa1   :  { %v236_v19 = vsel %vm86_vm0, %v528_v18, 0.0  ;;  %v240_v21 = vmul.f32 %v528_v18, %v528_v18 }
  0xa2   :  { %237 = vadd.xlane.f32.xlu0 %v236_v19  ;;  %v150_v19 = vperm.slane %v516_v9, 3 }
  0xa3   :  { %123 = vadd.xlane.f32.xlu1 %v122_v20  ;;  %v241_v22 = vsel %vm86_vm0, %v240_v21, 0.0 }
  0xaa   :  { %242 = vadd.xlane.f32.xlu0 %v241_v22 }
 0x10e   :  { %v112_v30 = vpop.xlane.xlu1 %111 }
 0x10f   :  { %v120_v32 = vmul.f32 %v536_v29, %v112_v30 }
 0x111   :  { %v126_v38 = vmul.f32 %v120_v32, %v120_v32  ;;  %v128_v61 = vsub.f32 %v521_v13, %v120_v32 }
 0x115   :  { %v238_v37 = vpop.xlane.xlu0 %237 }
 0x116   :  { %v124_v39 = vpop.xlane.xlu1 %123  ;;  %v239_v43 = vmul.f32 %v238_v37, %v536_v29 }
 0x117   :  { %v125_v40 = vmul.f32 %v124_v39, %v536_v29 }
 0x118   :  { %v245_v48 = vmul.f32 %v239_v43, %v239_v43  ;;  %v247_v6 = vsub.f32 %v528_v18, %v239_v43 }
 0x119   :  { %v127_v44 = vsub.f32 %v125_v40, %v126_v38 }
 0x11b   :  { %v129_v46 = vadd.f32 1e-05, %v127_v44 }
 0x11d   :  { %v243_v47 = vpop.xlane.xlu0 %242  ;;  %359 = vrsqrt.f32 %v129_v46  ;;  %vm136_vm2 = vweird.f32 %v129_v46 }
 0x11e   :  { %v244_v49 = vmul.f32 %v243_v47, %v536_v29 }
 0x120   :  { %v246_v50 = vsub.f32 %v244_v49, %v245_v48 }
 0x122   :  { %v248_v51 = vadd.f32 1e-05, %v246_v50 }
 0x123   :  { %v360_v52 = vpop.eup %359 }
 0x124   :  { %361 = vrsqrt.f32 %v248_v51  ;;  %v131_v53 = vmul.f32 %v360_v52, %v129_v46  ;;  %vm137_vm3 = vweird.f32 %v360_v52  ;;  %vm255_vm6 = vweird.f32 %v248_v51 }
 0x125   :  { %vm138_vm4 = vmor %vm136_vm2, %vm137_vm3 }
 0x126   :  { %v132_v54 = vmul.f32 %v360_v52, %v131_v53 }
 0x128   :  { %v133_v55 = vmul.f32 0.5, %v132_v54 }
 0x12a   :  { %v362_v56 = vpop.eup %361  ;;  %v134_v57 = vsub.f32 1.5, %v133_v55  ;;  %v200_v55 = vperm.slane %v516_v9, 5 }
 0x12b   :  { %v250_v58 = vmul.f32 %v362_v56, %v248_v51  ;;  %vm256_vm5 = vweird.f32 %v362_v56 }
 0x12c   :  { %v135_v59 = vmul.f32 %v360_v52, %v134_v57  ;;  %vm257_vm7 = vmor %vm255_vm6, %vm256_vm5 }
 0x12d   :  { %v251_v60 = vmul.f32 %v362_v56, %v250_v58  ;;  %v203_v58 = vperm.slane %v516_v9, 6 }
 0x12e   :  { %v139_v0 = vsel %vm138_vm4, %v360_v52, %v135_v59  ;;  %v198_v52 = vperm.slane %v516_v9, 4 }
 0x12f   :  { %v252_v63 = vmul.f32 0.5, %v251_v60  ;;  %v140_v1 = vmul.f32 %v139_v0, %v128_v61 }
 0x131   :  { %v253_v3 = vsub.f32 1.5, %v252_v63  ;;  %v142_v4 = vmul.f32 %v141_v62, %v140_v1 }
 0x133   :  { %v254_v5 = vmul.f32 %v362_v56, %v253_v3  ;;  %v144_v7 = vadd.f32 %v143_v2, %v142_v4  ;;  %v318_v4 = vperm.slane %v519_v12, 4 }
 0x135   :  { %v258_v10 = vsel %vm257_vm7, %v362_v56, %v254_v5  ;;  %v145_v11 = vmax.f32 %v144_v7, 0.0  ;;  %v320_v7 = vperm.slane %v519_v12, 5 }
 0x136   :  { %v259_v13 = vmul.f32 %v258_v10, %v247_v6 }
 0x137   :  { %346 = vmatmul.msk.f32.vlgmr.msra.gmra.mxu1 %vm86_vm0, %v145_v11  ;;  %v323_v11 = vperm.slane %v519_v12, 6 }
 0x138   :  { %v261_v15 = vmul.f32 %v260_v8, %v259_v13 }
 0x13a   :  { %v263_v16 = vadd.f32 %v262_v14, %v261_v15 }
 0x13c   :  { %v264_v17 = vmax.f32 %v263_v16, 0.0  ;;  %v328_v16 = vperm.slane %v519_v12, 7 }
 0x13e   :  { %348 = vmatmul.msk.f32.vlgmr.msra.gmra.mxu3 %vm86_vm0, %v264_v17 }
 0x1b4   :  { %v171_v20 = vpop.f32.mrf.mxu1 }
 0x1b5   :  { %v172_v18 = vadd.f32 %v171_v20, %v150_v19  ;;  %v208_v20 = vperm.slane %v516_v9, 7 }
 0x1b7   :  { %v174_v21 = vsel %vm86_vm0, %v172_v18, 0.0  ;;  %v178_v22 = vmul.f32 %v172_v18, %v172_v18 }
 0x1b8   :  { %175 = vadd.xlane.f32.xlu0 %v174_v21 }
 0x1b9   :  { %v179_v23 = vsel %vm86_vm0, %v178_v22, 0.0 }
 0x1ba   :  { %180 = vadd.xlane.f32.xlu1 %v179_v23 }
 0x1c1   :  { %v291_v25 = vpop.f32.mrf.mxu3 }
 0x1c2   :  { %v292_v26 = vadd.f32 %v291_v25, %v270_v24 }
 0x1c4   :  { %v294_v27 = vsel %vm86_vm0, %v292_v26, 0.0  ;;  %v298_v28 = vmul.f32 %v292_v26, %v292_v26 }
 0x1c5   :  { %295 = vadd.xlane.f32.xlu2 %v294_v27 }
 0x1c6   :  { %v299_v30 = vsel %vm86_vm0, %v298_v28, 0.0 }
 0x1cd   :  { %300 = vadd.xlane.f32.xlu2 %v299_v30 }
 0x22b   :  { %v176_v31 = vpop.xlane.xlu0 %175 }
 0x22c   :  { %v177_v32 = vmul.f32 %v176_v31, %v536_v29 }
 0x22d   :  { %v181_v33 = vpop.xlane.xlu1 %180 }
 0x22e   :  { %v183_v34 = vmul.f32 %v177_v32, %v177_v32  ;;  %v182_v35 = vmul.f32 %v181_v33, %v536_v29  ;;  %v185_v50 = vsub.f32 %v172_v18, %v177_v32 }
 0x230   :  { %v184_v36 = vsub.f32 %v182_v35, %v183_v34 }
 0x232   :  { %v186_v37 = vadd.f32 1e-05, %v184_v36 }
 0x234   :  { %363 = vrsqrt.f32 %v186_v37  ;;  %vm193_vm9 = vweird.f32 %v186_v37 }
 0x238   :  { %v296_v38 = vpop.xlane.xlu2 %295 }
 0x239   :  { %v297_v41 = vmul.f32 %v296_v38, %v536_v29 }
 0x23a   :  { %v364_v39 = vpop.eup %363 }
 0x23b   :  { %v188_v40 = vmul.f32 %v364_v39, %v186_v37  ;;  %v303_v45 = vmul.f32 %v297_v41, %v297_v41  ;;  %vm194_vm8 = vweird.f32 %v364_v39  ;;  %v305_v3 = vsub.f32 %v292_v26, %v297_v41 }
 0x23c   :  { %vm195_vm10 = vmor %vm193_vm9, %vm194_vm8 }
 0x23d   :  { %v189_v42 = vmul.f32 %v364_v39, %v188_v40 }
 0x23f   :  { %v190_v43 = vmul.f32 0.5, %v189_v42 }
 0x240   :  { %v301_v44 = vpop.xlane.xlu2 %300 }
 0x241   :  { %v302_v46 = vmul.f32 %v301_v44, %v536_v29  ;;  %v191_v47 = vsub.f32 1.5, %v190_v43 }
 0x243   :  { %v304_v48 = vsub.f32 %v302_v46, %v303_v45  ;;  %v192_v49 = vmul.f32 %v364_v39, %v191_v47 }
 0x245   :  { %v306_v51 = vadd.f32 1e-05, %v304_v48  ;;  %v196_v53 = vsel %vm195_vm10, %v364_v39, %v192_v49 }
 0x246   :  { %v197_v54 = vmul.f32 %v196_v53, %v185_v50 }
 0x247   :  { %365 = vrsqrt.f32 %v306_v51  ;;  %vm313_vm12 = vweird.f32 %v306_v51 }
 0x248   :  { %v199_v56 = vmul.f32 %v198_v52, %v197_v54 }
 0x24a   :  { %v201_v57 = vadd.f32 %v200_v55, %v199_v56 }
 0x24c   :  { %v202_v59 = vmax.f32 %v201_v57, 0.0 }
 0x24d   :  { %v366_v29 = vpop.eup %365 }
 0x24e   :  { %v308_v60 = vmul.f32 %v366_v29, %v306_v51  ;;  %v204_v61 = vmul.f32 %v203_v58, %v202_v59  ;;  %vm314_vm11 = vweird.f32 %v366_v29 }
 0x24f   :  { %vm315_vm13 = vmor %vm313_vm12, %vm314_vm11 }
 0x250   :  { %v309_v62 = vmul.f32 %v366_v29, %v308_v60  ;;  %v205_v63 = vsel %vm86_vm0, %v204_v61, 0.0 }
 0x251   :  { %206 = vadd.xlane.f32.xlu0 %v205_v63 }
 0x252   :  { %v310_v0 = vmul.f32 0.5, %v309_v62 }
 0x254   :  { %v311_v1 = vsub.f32 1.5, %v310_v0 }
 0x256   :  { %v312_v2 = vmul.f32 %v366_v29, %v311_v1 }
 0x258   :  { %v316_v5 = vsel %vm315_vm13, %v366_v29, %v312_v2 }
 0x259   :  { %v317_v6 = vmul.f32 %v316_v5, %v305_v3 }
 0x25b   :  { %v319_v8 = vmul.f32 %v318_v4, %v317_v6 }
 0x25d   :  { %v321_v10 = vadd.f32 %v320_v7, %v319_v8 }
 0x25f   :  { %v322_v13 = vmax.f32 %v321_v10, 0.0 }
 0x261   :  { %v324_v14 = vmul.f32 %v323_v11, %v322_v13 }
 0x263   :  { %v325_v15 = vsel %vm86_vm0, %v324_v14, 0.0 }
 0x264   :  { %326 = vadd.xlane.f32.xlu2 %v325_v15 }
 0x2c4   :  { %v207_v18 = vpop.xlane.xlu0 %206 }
 0x2c5   :  { %v209_v21 = vadd.f32 %v208_v20, %v207_v18 }
 0x2d7   :  { %v327_v17 = vpop.xlane.xlu2 %326 }
 0x2d8   :  { %v329_v19 = vadd.f32 %v328_v16, %v327_v17 }
 0x2da   :  { %331 = vrot.lane.b32.xlu1 %v329_v19, %s476_s2 }
 0x34c   :  { %v332_v22 = vpop.permute.xlu1 %331 }
 0x34d   :  { %v335_v23 = vsel %vm334_vm14, %v209_v21, %v332_v22 }
 0x34e   :  { %337 = vst.msk [vmem:[%s577_s4] sm:$0xff] %vm336_vm15, %v335_v23 }
 0x34f   :  { %342 = vsyncpa [#allocation3], 1 }
 0x350   :  { %343 = vsyncpa [#allocation5], 1 }
 0x351   :  { %344 = vsyncpa [#allocation8], 1 }

</bundles_post_ra>
